<compile_context>
chip_gen: v7x
topology: tpu7x:2x2x1
jax: 0.10.0
libtpu: 0.0.40
codegen_flags: <defaults>
</compile_context>

<pallas_src>
import functools
import math

import jax
import jax.numpy as jnp
from jax.experimental import pallas as pl
from jax.experimental.pallas import tpu as pltpu

_INV_SQRT2 = 0.7071067811865476


def _cdiv(a, b):
    return -(-a // b)


def _round_up(x, m):
    return _cdiv(x, m) * m


def _mlp_kernel(x_ref, w1_ref, b1_ref, w2_ref, b2_ref, o_ref, *,
                compute_dtype, approximate_gelu):
    # Cast inside the kernel (no wrapper-side HBM astype pass): x streams in at
    # its native dtype and is converted in VMEM right before the MXU.
    x = x_ref[...]
    if x.dtype != compute_dtype:
        x = x.astype(compute_dtype)
    # Linear 1: MXU matmul with f32 accumulation, bias added in f32.
    h = jnp.dot(x, w1_ref[...], preferred_element_type=jnp.float32) + b1_ref[...]
    # GELU in f32.  Exact erf matches torch.nn.GELU's default; approximate=True
    # routes the transcendental to the (otherwise idle) EUP slot when VALU-bound.
    if approximate_gelu:
        h = jax.nn.gelu(h, approximate=True)
    else:
        h = 0.5 * h * (1.0 + jax.lax.erf(h * _INV_SQRT2))
    # Dropout(p=0.0) == identity.
    # Linear 2.  Keep the LHS in f32 when the weights are f32 (exact path);
    # only quantize the GELU output when a narrower compute dtype is requested.
    lhs = h if w2_ref.dtype == jnp.float32 else h.astype(w2_ref.dtype)
    y = jnp.dot(lhs, w2_ref[...], preferred_element_type=jnp.float32) + b2_ref[...]
    o_ref[...] = y.astype(o_ref.dtype)


def mlp_pallas(x, w1, b1, w2, b2, *, tile_m=4096, compute_dtype=None,
               approximate_gelu=False, vmem_budget_bytes=None):
    """SwinIR MLP forward:  y = GELU(x @ W1 + b1) @ W2 + b2   (dropout p=0).

    x : (..., E); w1 : (E, H); b1 : (H,); w2 : (H, E); b2 : (E,).
    Weights are stored (in_features, out_features), i.e. the transpose of
    torch.nn.Linear.weight, so the kernel computes y = x @ W + b.

    compute_dtype: dtype the MXU sees for x / W (accumulation, bias adds and
    GELU stay in f32).  Defaults to x.dtype for exact parity with the PyTorch
    module; pass jnp.bfloat16 on v6e/v7x to halve streamed bytes on this
    HBM-bound kernel (slightly looser numerics).
    """
    *lead, E = x.shape
    H = w1.shape[1]
    assert w1.shape == (E, H) and w2.shape == (H, E)
    assert b1.shape == (H,) and b2.shape == (E,)

    tokens = 1
    for d in lead:
        tokens *= d

    out_dtype = x.dtype
    if compute_dtype is None:
        compute_dtype = x.dtype
    compute_dtype = jnp.dtype(compute_dtype)

    x_bpe = jnp.dtype(x.dtype).itemsize
    w_bpe = compute_dtype.itemsize
    out_bpe = jnp.dtype(out_dtype).itemsize

    # ---- lane-density fold: fold f consecutive tokens into the lane dim so the
    # stored last dim is exactly 128 (unmasked vst) instead of E < 128 (masked).
    fold = 1
    if 0 < E < 128 and 128 % E == 0:
        f = 128 // E
        if tokens % f == 0:
            fold = f
    # TODO(synk): for E < 128 that does not divide 128 (e.g. SwinIR embed_dim=60)
    # pad E to the nearest divisor of 128 and fold, instead of taking masked stores.
    lanes_in = fold * E
    lanes_mid = fold * H
    rows_total = tokens // fold            # folded rows streamed through the kernel

    # ---- generation-aware VMEM budget (v5e/v6e: 128 MiB physical, v7x: 64 MiB).
    try:
        info = pltpu.get_tpu_info()
        vmem_cap = int(getattr(info, "vmem_capacity_bytes", 64 * 1024 * 1024))
    except Exception:                       # no TPU visible -> conservative default
        vmem_cap = 64 * 1024 * 1024
    if vmem_budget_bytes is None:
        vmem_budget_bytes = int(vmem_cap * 0.70)

    # Resident weights/biases (constant index_map); count the default 2x
    # pipeline buffers explicitly so the tile cap is honest.
    weight_bytes = 2 * (2 * lanes_in * lanes_mid * w_bpe) + 2 * (lanes_mid + lanes_in) * 4
    # Per folded row: double-buffered x and out tiles + f32 intermediates.
    per_row_bytes = (2 * lanes_in * x_bpe + 2 * lanes_in * out_bpe
                     + lanes_mid * 4 + 2 * lanes_in * 4)
    # TODO(synk): if resident W1+W2 ever exceed the budget (very large E*H), add an
    # H-reduction grid axis with a f32 accumulator instead of shrinking the tile.
    avail = max(vmem_budget_bytes - weight_bytes, 8 * per_row_bytes)
    rows_cap = max(8, (avail // per_row_bytes) // 8 * 8)

    # ---- token tile: large enough to amortize the ~0.35 us/grid-step overhead,
    # clamped by the VMEM budget and the token count.
    tile_rows = max(8, (int(tile_m) // fold) // 8 * 8)
    tile_rows = min(tile_rows, rows_cap)
    # v7x megacore: keep at least 2 grid steps on the "parallel" axis when there
    # is enough work, so both TensorCores are busy; near-free on v5e/v6e.
    if rows_total >= 16:
        tile_rows = min(tile_rows, _round_up(_cdiv(rows_total, 2), 8))
    if tile_rows >= rows_total:
        tile_rows = rows_total             # single full-extent block (always legal)
    grid = _cdiv(rows_total, tile_rows)

    # ---- wrapper-side prep: only metadata reshapes on x (no pad / astype HBM
    # passes).  A ragged last grid block is handled by Pallas boundary masking:
    # out-of-bounds rows read unspecified data and are never written back, and
    # every output row depends only on its own input row.
    xf = jnp.asarray(x).reshape(rows_total, lanes_in)

    if fold > 1:
        eye = jnp.eye(fold, dtype=compute_dtype)
        w1k = jnp.kron(eye, w1.astype(compute_dtype))   # (f*E, f*H) block-diagonal
        w2k = jnp.kron(eye, w2.astype(compute_dtype))   # (f*H, f*E) block-diagonal
        b1k = jnp.tile(b1.astype(jnp.float32), fold).reshape(1, lanes_mid)
        b2k = jnp.tile(b2.astype(jnp.float32), fold).reshape(1, lanes_in)
    else:
        w1k = w1.astype(compute_dtype)
        w2k = w2.astype(compute_dtype)
        b1k = b1.astype(jnp.float32).reshape(1, H)
        b2k = b2.astype(jnp.float32).reshape(1, E)

    vmem_needed = weight_bytes + _round_up(tile_rows, 8) * per_row_bytes
    vmem_limit = int(min(max(int(vmem_needed * 1.5), 32 * 1024 * 1024),
                         int(vmem_cap * 0.95)))

    kernel = functools.partial(_mlp_kernel, compute_dtype=compute_dtype,
                               approximate_gelu=approximate_gelu)

    # Weights/biases have constant index_maps so they are fetched once and stay
    # resident; x / out tiles stream lane-dense through the default pipeline.
    out = pl.pallas_call(
        kernel,
        out_shape=jax.ShapeDtypeStruct((rows_total, lanes_in), out_dtype),
        grid_spec=pltpu.PrefetchScalarGridSpec(
            num_scalar_prefetch=0,
            grid=(grid,),
            in_specs=[
                pl.BlockSpec((tile_rows, lanes_in), lambda i: (i, 0)),    # x tile
                pl.BlockSpec((lanes_in, lanes_mid), lambda i: (0, 0)),    # W1 (resident)
                pl.BlockSpec((1, lanes_mid), lambda i: (0, 0)),           # b1
                pl.BlockSpec((lanes_mid, lanes_in), lambda i: (0, 0)),    # W2 (resident)
                pl.BlockSpec((1, lanes_in), lambda i: (0, 0)),            # b2
            ],
            out_specs=pl.BlockSpec((tile_rows, lanes_in), lambda i: (i, 0)),
        ),
        compiler_params=pltpu.CompilerParams(
            dimension_semantics=("parallel",),
            vmem_limit_bytes=vmem_limit,
        ),
    )(xf, w1k, b1k, w2k, b2k)

    return out.reshape(tokens, E).reshape(*lead, E)


def _reference_mlp(x, w1, b1, w2, b2):
    h = jnp.einsum("...e,eh->...h", x, w1) + b1
    h = 0.5 * h * (1.0 + jax.lax.erf(h * _INV_SQRT2))
    return jnp.einsum("...h,he->...e", h, w2) + b2


if __name__ == "__main__":
    # Small shapes consistent with the module: batch=2, seq=8, embed=32, hidden=64.
    B, N, E, H = 2, 8, 32, 64
    key = jax.random.PRNGKey(0)
    kx, k1, kb1, k2, kb2 = jax.random.split(key, 5)

    x = jax.random.normal(kx, (B, N, E), dtype=jnp.float32)
    # Deterministic synthetic parameters (not a checkpoint load).
    w1 = jax.random.normal(k1, (E, H), dtype=jnp.float32) * (1.0 / math.sqrt(E))
    b1 = jax.random.normal(kb1, (H,), dtype=jnp.float32) * 0.01
    w2 = jax.random.normal(k2, (H, E), dtype=jnp.float32) * (1.0 / math.sqrt(H))
    b2 = jax.random.normal(kb2, (E,), dtype=jnp.float32) * 0.01

    y = mlp_pallas(x, w1, b1, w2, b2)
    y = jax.block_until_ready(y)

    y_ref = _reference_mlp(x, w1, b1, w2, b2)
    assert y.shape == (B, N, E)
    assert jnp.allclose(y, y_ref, atol=2e-5, rtol=2e-5), float(jnp.max(jnp.abs(y - y_ref)))

    print("KERNEL_OK")
</pallas_src>

<mosaic_0001>
module attributes {stable_mosaic.version = 11 : i64} {
  func.func @_mlp_kernel(%arg0: i32, %arg1: memref<4x128xf32, #tpu.memory_space<vmem>>, %arg2: memref<128x256xf32, #tpu.memory_space<vmem>>, %arg3: memref<1x256xf32, #tpu.memory_space<vmem>>, %arg4: memref<256x128xf32, #tpu.memory_space<vmem>>, %arg5: memref<1x128xf32, #tpu.memory_space<vmem>>, %arg6: memref<4x128xf32, #tpu.memory_space<vmem>>) attributes {dimension_semantics = [#tpu.dimension_semantics<parallel>], iteration_bounds = array<i64: 1>, scalar_prefetch = 0 : i64, scratch_operands = 0 : i64, tpu.core_type = #tpu.core_type<tc>, window_params = [{transform_indices = @transform_0, window_bounds = array<i64: 4, 128>}, {pipeline_mode = #tpu.pipeline_mode<synchronous>, transform_indices = @transform_1, window_bounds = array<i64: 128, 256>}, {pipeline_mode = #tpu.pipeline_mode<synchronous>, transform_indices = @transform_2, window_bounds = array<i64: 1, 256>}, {pipeline_mode = #tpu.pipeline_mode<synchronous>, transform_indices = @transform_3, window_bounds = array<i64: 256, 128>}, {pipeline_mode = #tpu.pipeline_mode<synchronous>, transform_indices = @transform_4, window_bounds = array<i64: 1, 128>}, {transform_indices = @transform_5, window_bounds = array<i64: 4, 128>}]} {
    %c0 = arith.constant 0 : index
    %c0_0 = arith.constant 0 : index
    %0 = vector.load %arg1[%c0, %c0_0] : memref<4x128xf32, #tpu.memory_space<vmem>>, vector<4x128xf32>
    %c0_1 = arith.constant 0 : index
    %c0_2 = arith.constant 0 : index
    %1 = vector.load %arg2[%c0_1, %c0_2] : memref<128x256xf32, #tpu.memory_space<vmem>>, vector<128x256xf32>
    %cst = arith.constant dense<0.000000e+00> : vector<4x256xf32>
    %2 = tpu.matmul %0, %1, %cst {dimension_numbers = #tpu.dot_dimension_numbers<[1], [0], [0], [1], [0, 0, 1, 1], [], []>} : vector<4x128xf32>, vector<128x256xf32>, vector<4x256xf32> -> vector<4x256xf32>
    %c0_3 = arith.constant 0 : index
    %c0_4 = arith.constant 0 : index
    %3 = vector.load %arg3[%c0_3, %c0_4] : memref<1x256xf32, #tpu.memory_space<vmem>>, vector<1x256xf32>
    %4 = vector.broadcast %3 : vector<1x256xf32> to vector<4x256xf32>
    %5 = arith.addf %2, %4 : vector<4x256xf32>
    %cst_5 = arith.constant 5.000000e-01 : f32
    %6 = vector.broadcast %cst_5 : f32 to vector<4x256xf32>
    %7 = arith.mulf %6, %5 : vector<4x256xf32>
    %cst_6 = arith.constant 0.707106769 : f32
    %8 = vector.broadcast %cst_6 : f32 to vector<4x256xf32>
    %9 = arith.mulf %5, %8 : vector<4x256xf32>
    %10 = math.erf %9 : vector<4x256xf32>
    %cst_7 = arith.constant 1.000000e+00 : f32
    %11 = vector.broadcast %cst_7 : f32 to vector<4x256xf32>
    %12 = arith.addf %11, %10 : vector<4x256xf32>
    %13 = arith.mulf %7, %12 : vector<4x256xf32>
    %c0_8 = arith.constant 0 : index
    %c0_9 = arith.constant 0 : index
    %14 = vector.load %arg4[%c0_8, %c0_9] : memref<256x128xf32, #tpu.memory_space<vmem>>, vector<256x128xf32>
    %cst_10 = arith.constant dense<0.000000e+00> : vector<4x128xf32>
    %15 = tpu.matmul %13, %14, %cst_10 {dimension_numbers = #tpu.dot_dimension_numbers<[1], [0], [0], [1], [0, 0, 1, 1], [], []>} : vector<4x256xf32>, vector<256x128xf32>, vector<4x128xf32> -> vector<4x128xf32>
    %c0_11 = arith.constant 0 : index
    %c0_12 = arith.constant 0 : index
    %16 = vector.load %arg5[%c0_11, %c0_12] : memref<1x128xf32, #tpu.memory_space<vmem>>, vector<1x128xf32>
    %17 = vector.broadcast %16 : vector<1x128xf32> to vector<4x128xf32>
    %18 = arith.addf %15, %17 : vector<4x128xf32>
    %c0_13 = arith.constant 0 : index
    %c0_14 = arith.constant 0 : index
    %19 = vector.load %arg6[%c0_13, %c0_14] : memref<4x128xf32, #tpu.memory_space<vmem>>, vector<4x128xf32>
    tpu.vector_store %arg6[%c0_13, %c0_14], %18 {strides = array<i32>} : memref<4x128xf32, #tpu.memory_space<vmem>>, vector<4x128xf32>,
    return
  }
  func.func @transform_0(%arg0: i32) -> (i32, i32) {
    %c0_i32 = arith.constant 0 : i32
    %c0_i32_0 = arith.constant 0 : i32
    return %arg0, %c0_i32 : i32, i32
  }
  func.func @transform_1(%arg0: i32) -> (i32, i32) {
    %c0_i32 = arith.constant 0 : i32
    %c0_i32_0 = arith.constant 0 : i32
    %c0_i32_1 = arith.constant 0 : i32
    return %c0_i32, %c0_i32_0 : i32, i32
  }
  func.func @transform_2(%arg0: i32) -> (i32, i32) {
    %c0_i32 = arith.constant 0 : i32
    %c0_i32_0 = arith.constant 0 : i32
    %c0_i32_1 = arith.constant 0 : i32
    return %c0_i32, %c0_i32_0 : i32, i32
  }
  func.func @transform_3(%arg0: i32) -> (i32, i32) {
    %c0_i32 = arith.constant 0 : i32
    %c0_i32_0 = arith.constant 0 : i32
    %c0_i32_1 = arith.constant 0 : i32
    return %c0_i32, %c0_i32_0 : i32, i32
  }
  func.func @transform_4(%arg0: i32) -> (i32, i32) {
    %c0_i32 = arith.constant 0 : i32
    %c0_i32_0 = arith.constant 0 : i32
    %c0_i32_1 = arith.constant 0 : i32
    return %c0_i32, %c0_i32_0 : i32, i32
  }
  func.func @transform_5(%arg0: i32) -> (i32, i32) {
    %c0_i32 = arith.constant 0 : i32
    %c0_i32_0 = arith.constant 0 : i32
    return %arg0, %c0_i32 : i32, i32
  }
}

</mosaic_0001>

<bundles_post_ra>
// kernel: tpu_custom_call.1
= control target key start
LH: loop header
LB: loop body
LE: loop exit
PB: predicated region body
PF: predicated region fallthrough
CT: control target
= control target key end

     0   :  { %10 = vsyncpa [#allocation3], 0  ;;  %s612_s0 = inlined_call_operand.hbm [shape: f32[4,128], index: 0, kind: input, shape index: {}]   ;;  %s613_s1 = inlined_call_operand.hbm [shape: f32[128,256], index: 1, kind: input, shape index: {}]   ;;  %s614_s2 = inlined_call_operand.vmem [shape: f32[1,256], index: 2, kind: input, shape index: {}]   ;;  %s615_s3 = inlined_call_operand.hbm [shape: f32[256,128], index: 3, kind: input, shape index: {}]   ;;  %s616_s4 = inlined_call_operand.vmem [shape: f32[1,128], index: 4, kind: input, shape index: {}]   ;;  %s617_s5 = inlined_call_operand.hbm [shape: f32[4,128], index: 5, kind: output, shape index: {}]  }
   0x1   :  { %11 = vsyncpa [#allocation6], 0 }
   0x2   :  { %12 = vsyncpa [#allocation4], 0  ;;  %s519_s18 = smov [#allocation5]   ;;  %s425_s22 = scalar_lea.hbm %s613_s1, 4096 }
   0x3   :  { %s28_s19 = sshll.u32 %s519_s18, 4  ;;  %p426_p0 = scmp.ne.s32.totalorder %s613_s1, %s425_s22  ;;  %s29_s19 = int_to_ptr.vmem [resolvable:$true] %s28_s19 }
   0x4   :  { %p429_p1 = scmp.lt.u32.totalorder %s425_s22, %s613_s1 }
   0x6   :  { %p431_p2 = pnand %p429_p1, %p426_p0 }
   0x8   :  { %434 = shalt.err (!%p431_p2)
}
   0x9   :  { %s435_s27 = scalar_lea.vmem %s29_s19, 4096  ;;  %p440_p4 = scmp.lt.s32.totalorder %s29_s19, %s29_s19 }
   0xa   :  { %p436_p3 = scmp.ne.s32.totalorder %s29_s19, %s435_s27  ;;  %p441_p5 = scmp.lt.s32.totalorder %s435_s27, %s435_s27 }
   0xc   :  { %p442_p6 = por %p441_p5, %p440_p4 }
   0xe   :  { %p443_p7 = pnand %p442_p6, %p436_p3 }
  0x10   :  { %446 = shalt.err (!%p443_p7)
}
  0x11   :  { %s520_s28 = smov 256   ;;  %s521_s29 = smov 16  }
  0x12   :  { %34 = dma.hbm_to_vmem [thread:$0]  %s613_s1, 4096, %s29_s19, [#allocation6], %s520_s28, %s520_s28, %s521_s29  }
  0x13   :  { %s522_s7 = smov [#allocation2]   ;;  %s523_s9 = smov [#allocation7]  }
  0x14   :  { %s19_s8 = sshll.u32 %s522_s7, 4  ;;  %s42_s10 = sshll.u32 %s523_s9, 4  ;;  %s20_s8 = int_to_ptr.vmem [resolvable:$true] %s19_s8  ;;  %s43_s10 = int_to_ptr.vmem [resolvable:$true] %s42_s10 }
  0x15   :  { %s447_s13 = scalar_lea.hbm %s612_s0, 64 }
  0x16   :  { %p448_p8 = scmp.ne.s32.totalorder %s612_s0, %s447_s13  ;;  %p451_p9 = scmp.lt.u32.totalorder %s447_s13, %s612_s0 }
  0x18   :  { %p453_p10 = pnand %p451_p9, %p448_p8 }
  0x1a   :  { %456 = shalt.err (!%p453_p10)
}
  0x1b   :  { %s457_s1 = scalar_lea.vmem %s20_s8, 64  ;;  %p462_p12 = scmp.lt.s32.totalorder %s20_s8, %s20_s8 }
  0x1c   :  { %p458_p11 = scmp.ne.s32.totalorder %s20_s8, %s457_s1  ;;  %p463_p13 = scmp.lt.s32.totalorder %s457_s1, %s457_s1 }
  0x1e   :  { %p464_p0 = por %p463_p13, %p462_p12 }
  0x20   :  { %p465_p1 = pnand %p464_p0, %p458_p11 }
  0x22   :  { %468 = shalt.err (!%p465_p1)
}
  0x23   :  { %22 = dma.hbm_to_vmem [thread:$0]  %s612_s0, 64, %s20_s8, [#allocation3]  }
  0x24   :  { %s469_s22 = scalar_lea.hbm %s615_s3, 4096 }
  0x25   :  { %p470_p2 = scmp.ne.s32.totalorder %s615_s3, %s469_s22  ;;  %p473_p3 = scmp.lt.u32.totalorder %s469_s22, %s615_s3 }
  0x27   :  { %p475_p4 = pnand %p473_p3, %p470_p2 }
  0x29   :  { %478 = shalt.err (!%p475_p4)
}
  0x2a   :  { %s479_s27 = scalar_lea.vmem %s43_s10, 4096  ;;  %p484_p6 = scmp.lt.s32.totalorder %s43_s10, %s43_s10 }
  0x2b   :  { %p480_p5 = scmp.ne.s32.totalorder %s43_s10, %s479_s27  ;;  %p485_p7 = scmp.lt.s32.totalorder %s479_s27, %s479_s27 }
  0x2d   :  { %p486_p8 = por %p485_p7, %p484_p6 }
  0x2f   :  { %p487_p9 = pnand %p486_p8, %p480_p5 }
  0x31   :  { %490 = shalt.err (!%p487_p9)
}
  0x32   :  { %s524_s0 = smov 128   ;;  %s525_s28 = smov 8  }
  0x33   :  { %48 = dma.hbm_to_vmem [thread:$0]  %s615_s3, 4096, %s43_s10, [#allocation6], %s524_s0, %s524_s0, %s525_s28  }
  0x34   :  { %513 = dma.done.wait [#allocation3], 64  }
  0x35   :  { %514 = vsyncadd [#allocation3], 4294967232 }
  0x36   :  { %515 = dma.done.wait [#allocation6], 8192  }
  0x37   :  { %516 = vsyncadd [#allocation6], 4294959104  ;;  %v526_v0 = vmov 0.0   ;;  %v62_v1 = vld [vmem:[#allocation5 + $0x8] sm:$0xff]  ;;  %v64_v2 = vld [vmem:[#allocation5 + $0x18] sm:$0xff]  ;;  %s527_s8 = smov [#allocation8]  }
  0x38   :  { %169 = vmatprep.mubr.f32.mxu0 %v526_v0  ;;  %v61_v3 = vld [vmem:[#allocation5] sm:$0xff]  ;;  %v348_v4 = vpack.c.bf16 %v64_v2, %v62_v1  ;;  %v63_v5 = vld [vmem:[#allocation5 + $0x10] sm:$0xff]  ;;  %v66_v6 = vld [vmem:[#allocation5 + $0x28] sm:$0xff]  ;;  %s302_s9 = sshll.u32 %s527_s8, 4  ;;  %s303_s9 = int_to_ptr.vmem [resolvable:$true] %s302_s9 }
  0x39   :  { %v68_v7 = vld [vmem:[#allocation5 + $0x38] sm:$0xff]  ;;  %v350_v8 = vpack.c.bf16 %v63_v5, %v61_v3  ;;  %v65_v10 = vld [vmem:[#allocation5 + $0x20] sm:$0xff]  ;;  %v67_v11 = vld [vmem:[#allocation5 + $0x30] sm:$0xff]  ;;  %s491_s10 = scalar_lea.vmem %s303_s9, 64  ;;  %p496_p11 = scmp.lt.s32.totalorder %s303_s9, %s303_s9 }
  0x3a   :  { %v352_v9 = vpack.c.bf16 %v68_v7, %v66_v6  ;;  %v70_v12 = vld [vmem:[#allocation5 + $0x48] sm:$0xff]  ;;  %349 = vmatprep.subr.bf16.mxu0 %v348_v4  ;;  %v72_v13 = vld [vmem:[#allocation5 + $0x58] sm:$0xff]  ;;  %v354_v14 = vpack.c.bf16 %v67_v11, %v65_v10  ;;  %v69_v16 = vld [vmem:[#allocation5 + $0x40] sm:$0xff]  ;;  %p492_p10 = scmp.ne.s32.totalorder %s303_s9, %s491_s10  ;;  %p497_p12 = scmp.lt.s32.totalorder %s491_s10, %s491_s10 }
  0x3b   :  { %351 = vmatpush1.bf16.msra.mxu0 %v350_v8  ;;  %v356_v15 = vpack.c.bf16 %v72_v13, %v70_v12  ;;  %v71_v17 = vld [vmem:[#allocation5 + $0x50] sm:$0xff]  ;;  %v74_v18 = vld [vmem:[#allocation5 + $0x68] sm:$0xff]  ;;  %v76_v19 = vld [vmem:[#allocation5 + $0x78] sm:$0xff] }
  0x3c   :  { %353 = vmatprep.subr.bf16.mxu0 %v352_v9  ;;  %v358_v20 = vpack.c.bf16 %v71_v17, %v69_v16  ;;  %v360_v21 = vpack.c.bf16 %v76_v19, %v74_v18  ;;  %v73_v22 = vld [vmem:[#allocation5 + $0x60] sm:$0xff]  ;;  %v75_v23 = vld [vmem:[#allocation5 + $0x70] sm:$0xff]  ;;  %v78_v24 = vld [vmem:[#allocation5 + $0x88] sm:$0xff]  ;;  %p498_p13 = por %p497_p12, %p496_p11 }
  0x3d   :  { %v80_v25 = vld [vmem:[#allocation5 + $0x98] sm:$0xff]  ;;  %v77_v26 = vld [vmem:[#allocation5 + $0x80] sm:$0xff]  ;;  %v79_v27 = vld [vmem:[#allocation5 + $0x90] sm:$0xff]  ;;  %v362_v31 = vpack.c.bf16 %v75_v23, %v73_v22 }
  0x3e   :  { %v202_v28 = vld [vmem:[#allocation7 + $0x80] sm:$0xff]  ;;  %v203_v29 = vld [vmem:[#allocation7 + $0x88] sm:$0xff]  ;;  %v204_v34 = vld [vmem:[#allocation7 + $0x90] sm:$0xff]  ;;  %v364_v36 = vpack.c.bf16 %v80_v25, %v78_v24  ;;  %v366_v46 = vpack.c.bf16 %v79_v27, %v77_v26  ;;  %p499_p0 = pnand %p498_p13, %p492_p10 }
  0x3f   :  { %355 = vmatpush1.bf16.msra.mxu0 %v354_v14  ;;  %v186_v30 = vld [vmem:[#allocation7] sm:$0xff]  ;;  %v380_v32 = vpack.c.bf16 %v203_v29, %v202_v28  ;;  %v187_v33 = vld [vmem:[#allocation7 + $0x8] sm:$0xff]  ;;  %v205_v35 = vld [vmem:[#allocation7 + $0x98] sm:$0xff] }
  0x40   :  { %357 = vmatprep.subr.bf16.mxu0 %v356_v15  ;;  %v382_v37 = vpack.c.bf16 %v187_v33, %v186_v30  ;;  %v384_v38 = vpack.c.bf16 %v205_v35, %v204_v34  ;;  %v188_v39 = vld [vmem:[#allocation7 + $0x10] sm:$0xff]  ;;  %v189_v40 = vld [vmem:[#allocation7 + $0x18] sm:$0xff]  ;;  %v206_v41 = vld [vmem:[#allocation7 + $0xa0] sm:$0xff]  ;;  %v95_v34 = vlaneseq }
  0x41   :  { %v82_v42 = vld [vmem:[#allocation5 + $0xa8] sm:$0xff]  ;;  %v84_v43 = vld [vmem:[#allocation5 + $0xb8] sm:$0xff]  ;;  %381 = vmatprep.subr.bf16.mxu1 %v380_v32  ;;  %v386_v45 = vpack.c.bf16 %v189_v40, %v188_v39  ;;  %v190_v48 = vld [vmem:[#allocation7 + $0x20] sm:$0xff] }
  0x42   :  { %v207_v44 = vld [vmem:[#allocation7 + $0xa8] sm:$0xff]  ;;  %383 = vmatpush3.bf16.msra.mxu1 %v382_v37  ;;  %v368_v50 = vpack.c.bf16 %v84_v43, %v82_v42  ;;  %v81_v51 = vld [vmem:[#allocation5 + $0xa0] sm:$0xff]  ;;  %v83_v52 = vld [vmem:[#allocation5 + $0xb0] sm:$0xff]  ;;  %v96_v35 = vshrl.u32 %v95_v34, 7 }
  0x43   :  { %359 = vmatpush1.bf16.msra.mxu0 %v358_v20  ;;  %385 = vmatprep.subr.bf16.mxu1 %v384_v38  ;;  %v388_v47 = vpack.c.bf16 %v207_v44, %v206_v41  ;;  %v191_v49 = vld [vmem:[#allocation7 + $0x28] sm:$0xff]  ;;  %v88_v54 = vld [vmem:[#allocation5 + $0xd8] sm:$0xff]  ;;  %v370_v56 = vpack.c.bf16 %v83_v52, %v81_v51  ;;  %v85_v58 = vld [vmem:[#allocation5 + $0xc0] sm:$0xff] }
  0x44   :  { %361 = vmatprep.subr.bf16.mxu0 %v360_v21  ;;  %v86_v53 = vld [vmem:[#allocation5 + $0xc8] sm:$0xff]  ;;  %v390_v55 = vpack.c.bf16 %v191_v49, %v190_v48  ;;  %v87_v59 = vld [vmem:[#allocation5 + $0xd0] sm:$0xff]  ;;  %v92_v61 = vld [vmem:[#allocation5 + $0xf8] sm:$0xff]  ;;  %v101_v38 = vsub.s32 1, %v96_v35 }
  0x45   :  { %v372_v57 = vpack.c.bf16 %v88_v54, %v86_v53  ;;  %v90_v60 = vld [vmem:[#allocation5 + $0xe8] sm:$0xff]  ;;  %v374_v62 = vpack.c.bf16 %v87_v59, %v85_v58  ;;  %v89_v0 = vld [vmem:[#allocation5 + $0xe0] sm:$0xff]  ;;  %v91_v1 = vld [vmem:[#allocation5 + $0xf0] sm:$0xff] }
  0x46   :  { %387 = vmatpush3.bf16.msra.mxu1 %v386_v45  ;;  %v376_v63 = vpack.c.bf16 %v92_v61, %v90_v60  ;;  %v378_v2 = vpack.c.bf16 %v91_v1, %v89_v0  ;;  %v60_v3 = vld [vmem:[#allocation2] sm:$0xf]  ;;  %v208_v4 = vld [vmem:[#allocation7 + $0xb0] sm:$0xff]  ;;  %v210_v10 = vld [vmem:[#allocation7 + $0xc0] sm:$0xff] }
  0x47   :  { %363 = vmatpush1.bf16.msra.mxu0 %v362_v31  ;;  %389 = vmatprep.subr.bf16.mxu1 %v388_v47  ;;  %v209_v5 = vld [vmem:[#allocation7 + $0xb8] sm:$0xff]  ;;  %v192_v7 = vld [vmem:[#allocation7 + $0x30] sm:$0xff]  ;;  %v211_v11 = vld [vmem:[#allocation7 + $0xc8] sm:$0xff] }
  0x48   :  { %365 = vmatprep.subr.bf16.mxu0 %v364_v36  ;;  %v392_v6 = vpack.c.bf16 %v209_v5, %v208_v4  ;;  %v193_v8 = vld [vmem:[#allocation7 + $0x38] sm:$0xff]  ;;  %v396_v12 = vpack.c.bf16 %v211_v11, %v210_v10  ;;  %v194_v13 = vld [vmem:[#allocation7 + $0x40] sm:$0xff]  ;;  %v195_v14 = vld [vmem:[#allocation7 + $0x48] sm:$0xff]  ;;  %v97_v36 = vsub.s32 0, %v96_v35 }
  0x49   :  { %v394_v9 = vpack.c.bf16 %v193_v8, %v192_v7  ;;  %v398_v15 = vpack.c.bf16 %v195_v14, %v194_v13  ;;  %v212_v16 = vld [vmem:[#allocation7 + $0xd0] sm:$0xff]  ;;  %v213_v17 = vld [vmem:[#allocation7 + $0xd8] sm:$0xff]  ;;  %v214_v22 = vld [vmem:[#allocation7 + $0xe0] sm:$0xff] }
  0x4a   :  { %391 = vmatpush3.bf16.msra.mxu1 %v390_v55  ;;  %v400_v18 = vpack.c.bf16 %v213_v17, %v212_v16  ;;  %v196_v19 = vld [vmem:[#allocation7 + $0x50] sm:$0xff]  ;;  %v197_v20 = vld [vmem:[#allocation7 + $0x58] sm:$0xff]  ;;  %v215_v23 = vld [vmem:[#allocation7 + $0xe8] sm:$0xff] }
  0x4b   :  { %367 = vmatpush1.bf16.msra.mxu0 %v366_v46  ;;  %393 = vmatprep.subr.bf16.mxu1 %v392_v6  ;;  %v402_v21 = vpack.c.bf16 %v197_v20, %v196_v19  ;;  %v404_v24 = vpack.c.bf16 %v215_v23, %v214_v22  ;;  %v198_v25 = vld [vmem:[#allocation7 + $0x60] sm:$0xff]  ;;  %v199_v26 = vld [vmem:[#allocation7 + $0x68] sm:$0xff]  ;;  %v216_v28 = vld [vmem:[#allocation7 + $0xf0] sm:$0xff] }
  0x4c   :  { %369 = vmatprep.subr.bf16.mxu0 %v368_v50  ;;  %v406_v27 = vpack.c.bf16 %v199_v26, %v198_v25  ;;  %v217_v29 = vld [vmem:[#allocation7 + $0xf8] sm:$0xff]  ;;  %v200_v31 = vld [vmem:[#allocation7 + $0x70] sm:$0xff] }
  0x4d   :  { %v408_v30 = vpack.c.bf16 %v217_v29, %v216_v28  ;;  %v201_v32 = vld [vmem:[#allocation7 + $0x78] sm:$0xff] }
  0x4e   :  { %395 = vmatpush3.bf16.msra.mxu1 %v394_v9  ;;  %v410_v33 = vpack.c.bf16 %v201_v32, %v200_v31  ;;  %v93_v37 = vld [vmem:[%s614_s2] sm:$0x3] }
  0x4f   :  { %371 = vmatpush1.bf16.msra.mxu0 %v370_v56  ;;  %397 = vmatprep.subr.bf16.mxu1 %v396_v12  ;;  %v98_v39 = vrot.slane %v93_v37, %v97_v36  ;;  %v102_v40 = vrot.slane %v93_v37, %v101_v38  ;;  %v312_v56 = vld [vmem:[%s616_s4] ss:$0 sm:$0xff] }
  0x50   :  { %373 = vmatprep.subr.bf16.mxu0 %v372_v57 }
  0x52   :  { %399 = vmatpush3.bf16.msra.mxu1 %v398_v15 }
  0x53   :  { %375 = vmatpush1.bf16.msra.mxu0 %v374_v62  ;;  %401 = vmatprep.subr.bf16.mxu1 %v400_v18 }
  0x54   :  { %377 = vmatprep.subr.bf16.mxu0 %v376_v63 }
  0x56   :  { %403 = vmatpush3.bf16.msra.mxu1 %v402_v21 }
  0x57   :  { %379 = vmatpush1.bf16.msra.mxu0 %v378_v2  ;;  %405 = vmatprep.subr.bf16.mxu1 %v404_v24 }
  0x5a   :  { %170 = vmatmul.mubr.f32.vlgmr.msra.gmra.mrb[0].mxu0 %v60_v3  ;;  %407 = vmatpush3.bf16.msra.mxu1 %v406_v27 }
  0x5b   :  { %409 = vmatprep.subr.bf16.mxu1 %v408_v30 }
  0x5e   :  { %411 = vmatpush3.bf16.msra.mxu1 %v410_v33 }
 0x12d   :  { %v171_v41 = vpop.f32.mrb[0].mxu0 }
 0x12e   :  { %v172_v42 = vadd.f32 %v171_v41, %v98_v39  ;;  %v173_v43 = vpop.f32.mrb[1].mxu0 }
 0x12f   :  { %v174_v44 = vadd.f32 %v173_v43, %v102_v40 }
 0x130   :  { %v178_v45 = vmul.f32 0.70710677, %v172_v42  ;;  %v176_v52 = vmul.f32 0.5, %v172_v42 }
 0x131   :  { %v179_v46 = vmul.f32 0.70710677, %v174_v44  ;;  %v177_v50 = vmul.f32 0.5, %v174_v44 }
 0x132   :  { %421 = verf.f32 %v178_v45 }
 0x133   :  { %423 = verf.f32 %v179_v46 }
 0x13c   :  { %v422_v47 = vpop.eup %421 }
 0x13d   :  { %v424_v48 = vpop.eup %423  ;;  %v182_v49 = vadd.f32 1.0, %v422_v47 }
 0x13e   :  { %v183_v51 = vadd.f32 1.0, %v424_v48 }
 0x13f   :  { %v184_v54 = vmul.f32 %v182_v49, %v176_v52 }
 0x140   :  { %v185_v53 = vmul.f32 %v183_v51, %v177_v50 }
 0x142   :  { %289 = vmatprep.mubr.f32.mxu1 %v185_v53 }
 0x143   :  { %290 = vmatmul.mubr.f32.vlgmr.msra.gmra.mrb[0].mxu1 %v184_v54 }
 0x216   :  { %v345_v55 = vpop.f32.mrb[0].mxu1 }
 0x217   :  { %v346_v57 = vpop.f32.mrb[1].mxu1 }
 0x218   :  { %v347_v58 = vadd.f32 %v346_v57, %v345_v55 }
 0x21a   :  { %v292_v59 = vadd.f32 %v347_v58, %v312_v56 }
 0x21c   :  { %295 = vst [vmem:[#allocation8] sm:$0xf] %v292_v59 }
 0x21d   :  { %502 = shalt.err (!%p499_p0)
}
 0x21e   :  { %s503_s13 = scalar_lea.hbm %s617_s5, 64 }
 0x21f   :  { %p504_p1 = scmp.ne.s32.totalorder %s617_s5, %s503_s13  ;;  %p507_p2 = scmp.lt.u32.totalorder %s503_s13, %s617_s5 }
 0x221   :  { %p509_p3 = pnand %p507_p2, %p504_p1 }
 0x223   :  { %512 = shalt.err (!%p509_p3)
}
 0x224   :  { %305 = dma.vmem_to_hbm [thread:$0]  %s303_s9, 64, %s617_s5, [#allocation4]  }
 0x225   :  { %517 = dma.done.wait [#allocation4], 64  }
 0x226   :  { %518 = vsyncadd [#allocation4], 4294967232 }
 0x227   :  { %309 = vsyncpa [#allocation3], 1 }
 0x228   :  { %310 = vsyncpa [#allocation6], 1 }
 0x229   :  { %311 = vsyncpa [#allocation4], 1 }

</bundles_post_ra>
